<compile_context>
chip_gen: v7x
topology: tpu7x:2x2x1
jax: 0.10.0
libtpu: 0.0.40
codegen_flags: <defaults>
</compile_context>

<pallas_src>
import jax
import jax.numpy as jnp
from jax.experimental import pallas as pl
from jax.experimental.pallas import tpu as pltpu

EPS = 1e-5  # BatchNorm1d eps (PyTorch default)

# Branch classifier widths for sep_clf=False (see module __init__).
BRANCHES = (("head", 7), ("body", 13), ("leg", 12), ("foot", 7),
            ("bags", 4), ("general", 5))
TOT = sum(n for _, n in BRANCHES)          # 48 real logit columns
TOT_PAD = 128                              # lane-dense padded output width


def mb_head_kernel(x_ref, w1_ref, b1_ref, w2_ref, b2_ref, out_ref):
    # Global average pool: 1/(H*W) is folded into w1, so a plain sum suffices.
    pooled = jnp.sum(x_ref[...], axis=-1)                       # (TB, C)
    # Fused per-branch Linear(C->D) with BN folded in -> (TB, 6*D), then ReLU.
    h = jnp.dot(pooled, w1_ref[...],
                preferred_element_type=jnp.float32) + b1_ref[...]
    h = jnp.maximum(h, 0.0)
    # Fused classifiers via block-diagonal weight, columns padded to 128 lanes.
    out_ref[...] = jnp.dot(h, w2_ref[...],
                           preferred_element_type=jnp.float32) + b2_ref[...]


def mb_forward(x_nchw, packed):
    """x_nchw: (B, C, H, W) float32 'out_conv4' features. Returns dict of logits."""
    B, C, H, W = x_nchw.shape
    S = H * W
    x_flat = x_nchw.reshape(B, C, S)
    w1, b1, w2, b2 = packed["w1"], packed["b1"], packed["w2"], packed["b2"]
    K = w1.shape[1]                       # 6*D hidden width

    TB = min(B, 256)                      # batch tile (rows per grid step)
    grid = (pl.cdiv(B, TB),)

    out = pl.pallas_call(
        mb_head_kernel,
        out_shape=jax.ShapeDtypeStruct((B, TOT_PAD), jnp.float32),
        grid=grid,
        in_specs=[
            pl.BlockSpec((TB, C, S), lambda i: (i, 0, 0)),      # x tile
            pl.BlockSpec((C, K), lambda i: (0, 0)),             # fused fc weight
            pl.BlockSpec((1, K), lambda i: (0, 0)),             # fused fc bias
            pl.BlockSpec((K, TOT_PAD), lambda i: (0, 0)),       # block-diag clf
            pl.BlockSpec((1, TOT_PAD), lambda i: (0, 0)),       # clf bias (padded)
        ],
        out_specs=pl.BlockSpec((TB, TOT_PAD), lambda i: (i, 0)),
        compiler_params=pltpu.CompilerParams(
            dimension_semantics=("parallel",)),                 # shards TCs on v7x
    )(x_flat, w1, b1, w2, b2)

    # Slice the padded, concatenated logits back into the per-attribute dict.
    outs, off = {}, 0
    for name, n in BRANCHES:
        outs[name] = out[:, off:off + n]
        off += n
    return outs


def make_params(key, C, D, hw):
    """Deterministic per-branch parameters + host-side folded/packed weights.

    Folds:  w1' = w1 * (gamma*rsqrt(var+eps)) / (H*W)
            b1' = (b1 - mean) * gamma*rsqrt(var+eps) + beta
    so the kernel needs no BN math and can pool with a plain sum.
    """
    per_branch = {}
    for name, n in BRANCHES:
        key, k1, k2, k3, k4, k5, k6, k7, k8 = jax.random.split(key, 9)
        per_branch[name] = dict(
            w1=jax.random.normal(k1, (C, D), jnp.float32) * 0.05,   # Linear(C,D).T
            b1=jax.random.normal(k2, (D,), jnp.float32) * 0.05,
            gamma=1.0 + 0.1 * jax.random.normal(k3, (D,), jnp.float32),
            beta=0.1 * jax.random.normal(k4, (D,), jnp.float32),
            mean=0.1 * jax.random.normal(k5, (D,), jnp.float32),
            var=0.5 + jnp.abs(jax.random.normal(k6, (D,), jnp.float32)),
            w2=jax.random.normal(k7, (D, n), jnp.float32) * 0.05,   # Linear(D,n).T
            b2=jax.random.normal(k8, (n,), jnp.float32) * 0.05,
        )

    nb = len(BRANCHES)
    w1_cols, b1_cols = [], []
    for nm, _ in BRANCHES:
        p = per_branch[nm]
        scale = p["gamma"] * jax.lax.rsqrt(p["var"] + EPS)          # (D,)
        w1_cols.append(p["w1"] * scale[None, :] / float(hw))        # pool + BN fold
        b1_cols.append((p["b1"] - p["mean"]) * scale + p["beta"])
    w1 = jnp.concatenate(w1_cols, axis=1)                           # (C, 6D)
    b1 = jnp.concatenate(b1_cols)[None, :]                          # (1, 6D)

    D_ = per_branch[BRANCHES[0][0]]["w1"].shape[1]
    w2 = jnp.zeros((nb * D_, TOT_PAD), jnp.float32)                 # block-diag, padded
    b2 = jnp.zeros((TOT_PAD,), jnp.float32)
    off = 0
    for i, (nm, n) in enumerate(BRANCHES):
        w2 = w2.at[i * D_:(i + 1) * D_, off:off + n].set(per_branch[nm]["w2"])
        b2 = b2.at[off:off + n].set(per_branch[nm]["b2"])
        off += n

    packed = dict(w1=w1, b1=b1, w2=w2, b2=b2[None, :])
    return per_branch, packed


def reference_forward(x_nchw, per_branch):
    B, C = x_nchw.shape[:2]
    pooled = x_nchw.reshape(B, C, -1).mean(-1)
    outs = {}
    for name, _ in BRANCHES:
        p = per_branch[name]
        h = pooled @ p["w1"] + p["b1"]
        h = (h - p["mean"]) / jnp.sqrt(p["var"] + EPS) * p["gamma"] + p["beta"]
        h = jnp.maximum(h, 0.0)
        outs[name] = h @ p["w2"] + p["b2"]
    return outs


if __name__ == "__main__":
    B, C, H, W = 2, 32, 8, 8   # (batch, main_cov_size, spatial) -- small shapes
    D = 32                     # attr_dim

    key = jax.random.PRNGKey(0)
    key, kx = jax.random.split(key)
    x = jax.random.normal(kx, (B, C, H, W), jnp.float32)

    per_branch, packed = make_params(key, C, D, hw=H * W)

    outs = jax.block_until_ready(mb_forward(x, packed))
    refs = reference_forward(x, per_branch)

    for name, n in BRANCHES:
        assert outs[name].shape == (B, n), (name, outs[name].shape)
        assert jnp.allclose(outs[name], refs[name], rtol=1e-4, atol=1e-4), name

    print("KERNEL_OK")
</pallas_src>

<mosaic_0001>
module attributes {stable_mosaic.version = 11 : i64} {
  func.func @mb_head_kernel(%arg0: i32, %arg1: memref<2x32x64xf32, #tpu.memory_space<vmem>>, %arg2: memref<32x192xf32, #tpu.memory_space<vmem>>, %arg3: memref<1x192xf32, #tpu.memory_space<vmem>>, %arg4: memref<192x128xf32, #tpu.memory_space<vmem>>, %arg5: memref<1x128xf32, #tpu.memory_space<vmem>>, %arg6: memref<2x128xf32, #tpu.memory_space<vmem>>) attributes {dimension_semantics = [#tpu.dimension_semantics<parallel>], iteration_bounds = array<i64: 1>, scalar_prefetch = 0 : i64, scratch_operands = 0 : i64, tpu.core_type = #tpu.core_type<tc>, window_params = [{transform_indices = @transform_0, window_bounds = array<i64: 2, 32, 64>}, {pipeline_mode = #tpu.pipeline_mode<synchronous>, transform_indices = @transform_1, window_bounds = array<i64: 32, 192>}, {pipeline_mode = #tpu.pipeline_mode<synchronous>, transform_indices = @transform_2, window_bounds = array<i64: 1, 192>}, {pipeline_mode = #tpu.pipeline_mode<synchronous>, transform_indices = @transform_3, window_bounds = array<i64: 192, 128>}, {pipeline_mode = #tpu.pipeline_mode<synchronous>, transform_indices = @transform_4, window_bounds = array<i64: 1, 128>}, {transform_indices = @transform_5, window_bounds = array<i64: 2, 128>}]} {
    %c0 = arith.constant 0 : index
    %c0_0 = arith.constant 0 : index
    %c0_1 = arith.constant 0 : index
    %0 = vector.load %arg1[%c0, %c0_0, %c0_1] : memref<2x32x64xf32, #tpu.memory_space<vmem>>, vector<2x32x64xf32>
    %cst = arith.constant dense<0.000000e+00> : vector<2x32xf32>
    %1 = vector.multi_reduction <add>, %0, %cst [2] : vector<2x32x64xf32> to vector<2x32xf32>
    %c0_2 = arith.constant 0 : index
    %c0_3 = arith.constant 0 : index
    %2 = vector.load %arg2[%c0_2, %c0_3] : memref<32x192xf32, #tpu.memory_space<vmem>>, vector<32x192xf32>
    %cst_4 = arith.constant dense<0.000000e+00> : vector<2x192xf32>
    %3 = tpu.matmul %1, %2, %cst_4 {dimension_numbers = #tpu.dot_dimension_numbers<[1], [0], [0], [1], [0, 0, 1, 1], [], []>} : vector<2x32xf32>, vector<32x192xf32>, vector<2x192xf32> -> vector<2x192xf32>
    %c0_5 = arith.constant 0 : index
    %c0_6 = arith.constant 0 : index
    %4 = vector.load %arg3[%c0_5, %c0_6] : memref<1x192xf32, #tpu.memory_space<vmem>>, vector<1x192xf32>
    %5 = vector.broadcast %4 : vector<1x192xf32> to vector<2x192xf32>
    %6 = arith.addf %3, %5 : vector<2x192xf32>
    %cst_7 = arith.constant 0.000000e+00 : f32
    %7 = vector.broadcast %cst_7 : f32 to vector<2x192xf32>
    %8 = arith.maximumf %6, %7 : vector<2x192xf32>
    %c0_8 = arith.constant 0 : index
    %c0_9 = arith.constant 0 : index
    %9 = vector.load %arg4[%c0_8, %c0_9] : memref<192x128xf32, #tpu.memory_space<vmem>>, vector<192x128xf32>
    %cst_10 = arith.constant dense<0.000000e+00> : vector<2x128xf32>
    %10 = tpu.matmul %8, %9, %cst_10 {dimension_numbers = #tpu.dot_dimension_numbers<[1], [0], [0], [1], [0, 0, 1, 1], [], []>} : vector<2x192xf32>, vector<192x128xf32>, vector<2x128xf32> -> vector<2x128xf32>
    %c0_11 = arith.constant 0 : index
    %c0_12 = arith.constant 0 : index
    %11 = vector.load %arg5[%c0_11, %c0_12] : memref<1x128xf32, #tpu.memory_space<vmem>>, vector<1x128xf32>
    %12 = vector.broadcast %11 : vector<1x128xf32> to vector<2x128xf32>
    %13 = arith.addf %10, %12 : vector<2x128xf32>
    %c0_13 = arith.constant 0 : index
    %c0_14 = arith.constant 0 : index
    %14 = vector.load %arg6[%c0_13, %c0_14] : memref<2x128xf32, #tpu.memory_space<vmem>>, vector<2x128xf32>
    tpu.vector_store %arg6[%c0_13, %c0_14], %13 {strides = array<i32>} : memref<2x128xf32, #tpu.memory_space<vmem>>, vector<2x128xf32>,
    return
  }
  func.func @transform_0(%arg0: i32) -> (i32, i32, i32) {
    %c0_i32 = arith.constant 0 : i32
    %c0_i32_0 = arith.constant 0 : i32
    %c0_i32_1 = arith.constant 0 : i32
    return %arg0, %c0_i32, %c0_i32_0 : i32, i32, i32
  }
  func.func @transform_1(%arg0: i32) -> (i32, i32) {
    %c0_i32 = arith.constant 0 : i32
    %c0_i32_0 = arith.constant 0 : i32
    %c0_i32_1 = arith.constant 0 : i32
    return %c0_i32, %c0_i32_0 : i32, i32
  }
  func.func @transform_2(%arg0: i32) -> (i32, i32) {
    %c0_i32 = arith.constant 0 : i32
    %c0_i32_0 = arith.constant 0 : i32
    %c0_i32_1 = arith.constant 0 : i32
    return %c0_i32, %c0_i32_0 : i32, i32
  }
  func.func @transform_3(%arg0: i32) -> (i32, i32) {
    %c0_i32 = arith.constant 0 : i32
    %c0_i32_0 = arith.constant 0 : i32
    %c0_i32_1 = arith.constant 0 : i32
    return %c0_i32, %c0_i32_0 : i32, i32
  }
  func.func @transform_4(%arg0: i32) -> (i32, i32) {
    %c0_i32 = arith.constant 0 : i32
    %c0_i32_0 = arith.constant 0 : i32
    %c0_i32_1 = arith.constant 0 : i32
    return %c0_i32, %c0_i32_0 : i32, i32
  }
  func.func @transform_5(%arg0: i32) -> (i32, i32) {
    %c0_i32 = arith.constant 0 : i32
    %c0_i32_0 = arith.constant 0 : i32
    return %arg0, %c0_i32 : i32, i32
  }
}

</mosaic_0001>

<bundles_post_ra>
// kernel: tpu_custom_call.1
= control target key start
LH: loop header
LB: loop body
LE: loop exit
PB: predicated region body
PF: predicated region fallthrough
CT: control target
= control target key end

     0   :  { %10 = vsyncpa [#allocation3], 0  ;;  %s634_s0 = inlined_call_operand.hbm [shape: f32[2,32,64], index: 0, kind: input, shape index: {}]   ;;  %s635_s1 = inlined_call_operand.hbm [shape: f32[32,192], index: 1, kind: input, shape index: {}]   ;;  %s636_s2 = inlined_call_operand.vmem [shape: f32[1,192], index: 2, kind: input, shape index: {}]   ;;  %s637_s3 = inlined_call_operand.hbm [shape: f32[192,128], index: 3, kind: input, shape index: {}]   ;;  %s638_s4 = inlined_call_operand.vmem [shape: f32[1,128], index: 4, kind: input, shape index: {}]   ;;  %s639_s5 = inlined_call_operand.hbm [shape: f32[2,128], index: 5, kind: output, shape index: {}]  }
   0x1   :  { %11 = vsyncpa [#allocation6], 0 }
   0x2   :  { %12 = vsyncpa [#allocation4], 0  ;;  %s519_s18 = smov [#allocation5]   ;;  %s425_s22 = scalar_lea.hbm %s635_s1, 1024 }
   0x3   :  { %s30_s19 = sshll.u32 %s519_s18, 4  ;;  %p426_p0 = scmp.ne.s32.totalorder %s635_s1, %s425_s22  ;;  %s31_s19 = int_to_ptr.vmem [resolvable:$true] %s30_s19 }
   0x4   :  { %p429_p1 = scmp.lt.u32.totalorder %s425_s22, %s635_s1 }
   0x6   :  { %p431_p2 = pnand %p429_p1, %p426_p0 }
   0x8   :  { %434 = shalt.err (!%p431_p2)
}
   0x9   :  { %s435_s27 = scalar_lea.vmem %s31_s19, 1024  ;;  %p440_p4 = scmp.lt.s32.totalorder %s31_s19, %s31_s19 }
   0xa   :  { %p436_p3 = scmp.ne.s32.totalorder %s31_s19, %s435_s27  ;;  %p441_p5 = scmp.lt.s32.totalorder %s435_s27, %s435_s27 }
   0xc   :  { %p442_p6 = por %p441_p5, %p440_p4 }
   0xe   :  { %p443_p7 = pnand %p442_p6, %p436_p3 }
  0x10   :  { %446 = shalt.err (!%p443_p7)
}
  0x11   :  { %s520_s28 = smov 256   ;;  %s521_s29 = smov 16  }
  0x12   :  { %36 = dma.hbm_to_vmem [thread:$0]  %s635_s1, 1024, %s31_s19, [#allocation6], %s520_s28, %s520_s28, %s521_s29  }
  0x13   :  { %s522_s7 = smov [#allocation2]   ;;  %s447_s11 = scalar_lea.hbm %s634_s0, 1024 }
  0x14   :  { %s18_s8 = sshll.u32 %s522_s7, 4  ;;  %p448_p8 = scmp.ne.s32.totalorder %s634_s0, %s447_s11  ;;  %s19_s8 = int_to_ptr.vmem [resolvable:$true] %s18_s8 }
  0x15   :  { %p451_p9 = scmp.lt.u32.totalorder %s447_s11, %s634_s0 }
  0x17   :  { %p453_p10 = pnand %p451_p9, %p448_p8 }
  0x19   :  { %456 = shalt.err (!%p453_p10)
}
  0x1a   :  { %s457_s16 = scalar_lea.vmem %s19_s8, 1024  ;;  %p462_p12 = scmp.lt.s32.totalorder %s19_s8, %s19_s8 }
  0x1b   :  { %p458_p11 = scmp.ne.s32.totalorder %s19_s8, %s457_s16  ;;  %p463_p13 = scmp.lt.s32.totalorder %s457_s16, %s457_s16 }
  0x1d   :  { %p464_p0 = por %p463_p13, %p462_p12 }
  0x1f   :  { %p465_p1 = pnand %p464_p0, %p458_p11 }
  0x21   :  { %468 = shalt.err (!%p465_p1)
}
  0x22   :  { %s523_s1 = smov 128   ;;  %s524_s17 = smov 8  }
  0x23   :  { %24 = dma.hbm_to_vmem [thread:$0]  %s634_s0, 1024, %s19_s8, [#allocation3], %s523_s1, %s523_s1, %s524_s17  }
  0x24   :  { %s525_s20 = smov [#allocation7]   ;;  %s469_s24 = scalar_lea.hbm %s637_s3, 3072 }
  0x25   :  { %s44_s21 = sshll.u32 %s525_s20, 4  ;;  %p470_p2 = scmp.ne.s32.totalorder %s637_s3, %s469_s24  ;;  %s45_s21 = int_to_ptr.vmem [resolvable:$true] %s44_s21 }
  0x26   :  { %p473_p3 = scmp.lt.u32.totalorder %s469_s24, %s637_s3 }
  0x28   :  { %p475_p4 = pnand %p473_p3, %p470_p2 }
  0x2a   :  { %478 = shalt.err (!%p475_p4)
}
  0x2b   :  { %s479_s29 = scalar_lea.vmem %s45_s21, 3072  ;;  %p484_p6 = scmp.lt.s32.totalorder %s45_s21, %s45_s21 }
  0x2c   :  { %p480_p5 = scmp.ne.s32.totalorder %s45_s21, %s479_s29  ;;  %p485_p7 = scmp.lt.s32.totalorder %s479_s29, %s479_s29 }
  0x2e   :  { %p486_p8 = por %p485_p7, %p484_p6 }
  0x30   :  { %p487_p9 = pnand %p486_p8, %p480_p5 }
  0x32   :  { %490 = shalt.err (!%p487_p9)
}
  0x33   :  { %50 = dma.hbm_to_vmem [thread:$0]  %s637_s3, 3072, %s45_s21, [#allocation6], %s523_s1, %s523_s1, %s524_s17  }
  0x34   :  { %513 = dma.done.wait [#allocation3], 1024  }
  0x35   :  { %514 = vsyncadd [#allocation3], 4294966272 }
  0x36   :  { %515 = dma.done.wait [#allocation6], 4096  }
  0x37   :  { %516 = vsyncadd [#allocation6], 4294963200  ;;  %vm70_vm0 = vcmask 523264   ;;  %v66_v0 = vld [vmem:[#allocation2 + $0x20] sm:$0xff]  ;;  %v67_v2 = vld [vmem:[#allocation2 + $0x28] sm:$0xff]  ;;  %v526_v28 = vmov 0.0   ;;  %v105_v60 = vlaneseq }
  0x38   :  { %v62_v1 = vld [vmem:[#allocation2] sm:$0xff]  ;;  %v83_v3 = vsel %vm70_vm0, %v66_v0, 0.0  ;;  %v63_v5 = vld [vmem:[#allocation2 + $0x8] sm:$0xff]  ;;  %v86_v6 = vsel %vm70_vm0, %v67_v2, 0.0  ;;  %v68_v8 = vld [vmem:[#allocation2 + $0x30] sm:$0xff]  ;;  %238 = vmatprep.mubr.f32.mxu0 %v526_v28  ;;  %v527_v32 = vmov 0.0|0.0  }
  0x39   :  { %v71_v4 = vsel %vm70_vm0, %v62_v1, 0.0  ;;  %84 = vadd.xlane.f32.xlu1 %v83_v3  ;;  %v74_v7 = vsel %vm70_vm0, %v63_v5, 0.0  ;;  %v64_v9 = vld [vmem:[#allocation2 + $0x10] sm:$0xff]  ;;  %v89_v10 = vsel %vm70_vm0, %v68_v8, 0.0  ;;  %v69_v12 = vld [vmem:[#allocation2 + $0x38] sm:$0xff]  ;;  %v96_v16 = vld [vmem:[#allocation5 + $0x8] sm:$0xff]  ;;  %379 = vmatprep.subr.bf16.mxu1 %v527_v32 }
  0x3a   :  { %72 = vadd.xlane.f32.xlu0 %v71_v4  ;;  %v77_v11 = vsel %vm70_vm0, %v64_v9, 0.0  ;;  %v65_v13 = vld [vmem:[#allocation2 + $0x18] sm:$0xff]  ;;  %v92_v14 = vsel %vm70_vm0, %v69_v12, 0.0  ;;  %v95_v19 = vld [vmem:[#allocation5] sm:$0xff]  ;;  %v97_v20 = vld [vmem:[#allocation5 + $0x10] sm:$0xff]  ;;  %v124_v61 = vand.u32 127, %v105_v60 }
  0x3b   :  { %v80_v15 = vsel %vm70_vm0, %v65_v13, 0.0  ;;  %v98_v17 = vld [vmem:[#allocation5 + $0x18] sm:$0xff]  ;;  %v373_v21 = vpack.c.bf16 %v97_v20, %v95_v19  ;;  %v100_v22 = vld [vmem:[#allocation5 + $0x28] sm:$0xff]  ;;  %v99_v25 = vld [vmem:[#allocation5 + $0x20] sm:$0xff]  ;;  %v106_v2 = vshrl.u32 %v105_v60, 7  ;;  %vm134_vm1 = vcmask 130112  }
  0x3c   :  { %v371_v18 = vpack.c.bf16 %v98_v17, %v96_v16  ;;  %v102_v23 = vld [vmem:[#allocation5 + $0x38] sm:$0xff]  ;;  %v101_v26 = vld [vmem:[#allocation5 + $0x30] sm:$0xff]  ;;  %v247_v29 = vld [vmem:[#allocation7] sm:$0xff]  ;;  %v129_v0 = vadd.s32 4294967288, %v124_v61  ;;  %v136_v1 = vadd.s32 4294967280, %v124_v61  ;;  %vm141_vm2 = vcmask 195712  }
  0x3d   :  { %87 = vadd.xlane.f32.xlu1 %v86_v6  ;;  %v375_v24 = vpack.c.bf16 %v102_v23, %v100_v22  ;;  %v377_v27 = vpack.c.bf16 %v101_v26, %v99_v25  ;;  %v248_v30 = vld [vmem:[#allocation7 + $0x8] sm:$0xff]  ;;  %v249_v31 = vld [vmem:[#allocation7 + $0x10] sm:$0xff]  ;;  %v250_v34 = vld [vmem:[#allocation7 + $0x18] sm:$0xff]  ;;  %v143_v6 = vadd.s32 4294967272, %v124_v61  ;;  %v127_v8 = vsub.s32 %v124_v61, %v106_v2  ;;  %s528_s9 = smov [#allocation8]  }
  0x3e   :  { %75 = vadd.xlane.f32.xlu0 %v74_v7  ;;  %372 = vmatprep.subr.bf16.mxu0 %v371_v18  ;;  %v380_v33 = vpack.c.bf16 %v248_v30, %v247_v29  ;;  %v383_v35 = vpack.c.bf16 %v250_v34, %v249_v31  ;;  %v251_v36 = vld [vmem:[#allocation7 + $0x20] sm:$0xff]  ;;  %v252_v37 = vld [vmem:[#allocation7 + $0x28] sm:$0xff]  ;;  %v253_v39 = vld [vmem:[#allocation7 + $0x30] sm:$0xff]  ;;  %v132_v5 = vsub.s32 %v129_v0, %v106_v2  ;;  %vm148_vm3 = vcmask 261312   ;;  %s358_s10 = sshll.u32 %s528_s9, 4  ;;  %s359_s10 = int_to_ptr.vmem [resolvable:$true] %s358_s10 }
  0x3f   :  { %374 = vmatpush1.bf16.msra.mxu0 %v373_v21  ;;  %v386_v38 = vpack.c.bf16 %v252_v37, %v251_v36  ;;  %v254_v40 = vld [vmem:[#allocation7 + $0x38] sm:$0xff]  ;;  %v255_v42 = vld [vmem:[#allocation7 + $0x40] sm:$0xff]  ;;  %v256_v43 = vld [vmem:[#allocation7 + $0x48] sm:$0xff]  ;;  %v139_v7 = vsub.s32 %v136_v1, %v106_v2  ;;  %v146_v13 = vsub.s32 %v143_v6, %v106_v2  ;;  %vm169_vm4 = vcmask 1041409   ;;  %p496_p11 = scmp.lt.s32.totalorder %s359_s10, %s359_s10 }
  0x40   :  { %376 = vmatprep.subr.bf16.mxu0 %v375_v24  ;;  %381 = vmatpush1.bf16.msra.mxu1 %v380_v33  ;;  %v389_v41 = vpack.c.bf16 %v254_v40, %v253_v39  ;;  %v392_v44 = vpack.c.bf16 %v256_v43, %v255_v42  ;;  %v257_v45 = vld [vmem:[#allocation7 + $0x50] sm:$0xff]  ;;  %v258_v46 = vld [vmem:[#allocation7 + $0x58] sm:$0xff]  ;;  %v259_v48 = vld [vmem:[#allocation7 + $0x60] sm:$0xff]  ;;  %vm171_vm5 = vcmask 261120   ;;  %v107_v36 = vsub.s32 0, %v106_v2 }
  0x41   :  { %90 = vadd.xlane.f32.xlu1 %v89_v10  ;;  %382 = vmatprep.subr.bf16.mxu1 %v527_v32  ;;  %v395_v47 = vpack.c.bf16 %v258_v46, %v257_v45  ;;  %v260_v49 = vld [vmem:[#allocation7 + $0x68] sm:$0xff]  ;;  %v261_v51 = vld [vmem:[#allocation7 + $0x70] sm:$0xff]  ;;  %v262_v52 = vld [vmem:[#allocation7 + $0x78] sm:$0xff] }
  0x42   :  { %78 = vadd.xlane.f32.xlu0 %v77_v11  ;;  %v398_v50 = vpack.c.bf16 %v260_v49, %v259_v48  ;;  %v401_v53 = vpack.c.bf16 %v262_v52, %v261_v51  ;;  %v263_v54 = vld [vmem:[#allocation7 + $0x80] sm:$0xff]  ;;  %v264_v55 = vld [vmem:[#allocation7 + $0x88] sm:$0xff]  ;;  %v265_v57 = vld [vmem:[#allocation7 + $0x90] sm:$0xff] }
  0x43   :  { %378 = vmatpush1.bf16.msra.mxu0 %v377_v27  ;;  %v404_v56 = vpack.c.bf16 %v264_v55, %v263_v54  ;;  %v266_v58 = vld [vmem:[#allocation7 + $0x98] sm:$0xff]  ;;  %v267_v29 = vld [vmem:[#allocation7 + $0xa0] sm:$0xff]  ;;  %v268_v30 = vld [vmem:[#allocation7 + $0xa8] sm:$0xff] }
  0x44   :  { %384 = vmatpush1.bf16.msra.mxu1 %v383_v35  ;;  %v407_v59 = vpack.c.bf16 %v266_v58, %v265_v57  ;;  %v410_v31 = vpack.c.bf16 %v268_v30, %v267_v29  ;;  %v269_v33 = vld [vmem:[#allocation7 + $0xb0] sm:$0xff]  ;;  %v270_v34 = vld [vmem:[#allocation7 + $0xb8] sm:$0xff]  ;;  %v103_v37 = vld [vmem:[%s636_s2] sm:$0x3]  ;;  %s491_s2 = scalar_lea.vmem %s359_s10, 32 }
  0x45   :  { %93 = vadd.xlane.f32.xlu1 %v92_v14  ;;  %385 = vmatprep.subr.bf16.mxu1 %v527_v32  ;;  %v413_v35 = vpack.c.bf16 %v270_v34, %v269_v33  ;;  %v108_v39 = vrot.slane %v103_v37, %v107_v36  ;;  %p492_p10 = scmp.ne.s32.totalorder %s359_s10, %s491_s2  ;;  %p497_p12 = scmp.lt.s32.totalorder %s491_s2, %s491_s2 }
  0x46   :  { %81 = vadd.xlane.f32.xlu0 %v80_v15 }
  0x47   :  { %p498_p13 = por %p497_p12, %p496_p11 }
  0x48   :  { %387 = vmatpush1.bf16.msra.mxu1 %v386_v38  ;;  %v111_v38 = vsub.s32 1, %v106_v2 }
  0x49   :  { %388 = vmatprep.subr.bf16.mxu1 %v527_v32  ;;  %p499_p0 = pnand %p498_p13, %p492_p10 }
  0x4a   :  { %v112_v40 = vrot.slane %v103_v37, %v111_v38 }
  0x4c   :  { %390 = vmatpush1.bf16.msra.mxu1 %v389_v41 }
  0x4d   :  { %391 = vmatprep.subr.bf16.mxu1 %v527_v32 }
  0x50   :  { %393 = vmatpush1.bf16.msra.mxu1 %v392_v44 }
  0x51   :  { %394 = vmatprep.subr.bf16.mxu1 %v527_v32 }
  0x54   :  { %396 = vmatpush1.bf16.msra.mxu1 %v395_v47 }
  0x55   :  { %397 = vmatprep.subr.bf16.mxu1 %v527_v32 }
  0x58   :  { %399 = vmatpush1.bf16.msra.mxu1 %v398_v50 }
  0x59   :  { %400 = vmatprep.subr.bf16.mxu1 %v527_v32 }
  0x5c   :  { %402 = vmatpush1.bf16.msra.mxu1 %v401_v53 }
  0x5d   :  { %403 = vmatprep.subr.bf16.mxu1 %v527_v32 }
  0x60   :  { %405 = vmatpush1.bf16.msra.mxu1 %v404_v56 }
  0x61   :  { %406 = vmatprep.subr.bf16.mxu1 %v527_v32 }
  0x64   :  { %408 = vmatpush1.bf16.msra.mxu1 %v407_v59 }
  0x65   :  { %409 = vmatprep.subr.bf16.mxu1 %v527_v32 }
  0x68   :  { %411 = vmatpush1.bf16.msra.mxu1 %v410_v31 }
  0x69   :  { %412 = vmatprep.subr.bf16.mxu1 %v527_v32  ;;  %v369_v32 = vld [vmem:[%s638_s4] ss:$0 sm:$0xff] }
  0x6c   :  { %414 = vmatpush1.bf16.msra.mxu1 %v413_v35 }
  0xc6   :  { %v85_v62 = vpop.xlane.xlu1 %84 }
  0xc7   :  { %v73_v63 = vpop.xlane.xlu0 %72  ;;  %v153_v16 = vrot.slane %v85_v62, %v127_v8 }
  0xc8   :  { %v128_v17 = vrot.slane %v73_v63, %v127_v8 }
  0xca   :  { %v88_v3 = vpop.xlane.xlu1 %87 }
  0xcb   :  { %v76_v4 = vpop.xlane.xlu0 %75  ;;  %v157_v11 = vrot.slane %v88_v3, %v132_v5 }
  0xcc   :  { %v133_v12 = vrot.slane %v76_v4, %v132_v5 }
  0xcd   :  { %v158_v20 = vsel %vm134_vm1, %v157_v11, %v153_v16 }
  0xce   :  { %v91_v9 = vpop.xlane.xlu1 %90  ;;  %v135_v21 = vsel %vm134_vm1, %v133_v12, %v128_v17 }
  0xcf   :  { %v79_v10 = vpop.xlane.xlu0 %78  ;;  %v162_v14 = vrot.slane %v91_v9, %v139_v7 }
  0xd0   :  { %v140_v15 = vrot.slane %v79_v10, %v139_v7 }
  0xd1   :  { %v163_v24 = vsel %vm141_vm2, %v162_v14, %v158_v20 }
  0xd2   :  { %v94_v18 = vpop.xlane.xlu1 %93  ;;  %v142_v25 = vsel %vm141_vm2, %v140_v15, %v135_v21 }
  0xd3   :  { %v82_v19 = vpop.xlane.xlu0 %81  ;;  %v167_v22 = vrot.slane %v94_v18, %v146_v13 }
  0xd4   :  { %v147_v23 = vrot.slane %v82_v19, %v146_v13 }
  0xd5   :  { %v168_v26 = vsel %vm148_vm3, %v167_v22, %v163_v24 }
  0xd6   :  { %v149_v27 = vsel %vm148_vm3, %v147_v23, %v142_v25 }
  0xd7   :  { %v170_v28 = vsel %vm169_vm4, %v168_v26, %v149_v27 }
  0xd8   :  { %368 = vmatmul.mubr.msk.f32.vlgmr.msra.gmra.mrb[0].mxu0 %vm171_vm5, %v170_v28 }
 0x1ab   :  { %v240_v41 = vpop.f32.mrb[0].mxu0 }
 0x1ac   :  { %v241_v42 = vadd.f32 %v240_v41, %v108_v39  ;;  %v242_v43 = vpop.f32.mrb[1].mxu0 }
 0x1ad   :  { %v243_v44 = vadd.f32 %v242_v43, %v112_v40 }
 0x1ae   :  { %v245_v46 = vmax.f32 %v241_v42, 0.0 }
 0x1af   :  { %v246_v45 = vmax.f32 %v243_v44, 0.0 }
 0x1b1   :  { %370 = vmatprep.mubr.msk.f32.mxu1 %vm70_vm0, %v246_v45 }
 0x1b2   :  { %346 = vmatmul.mubr.f32.vlgmr.msra.gmra.mrb[0].mxu1 %v245_v46 }
 0x285   :  { %v347_v47 = vpop.f32.mrb[0].mxu1 }
 0x286   :  { %v348_v48 = vadd.f32 %v369_v32, %v347_v47  ;;  %v349_v49 = vpop.f32.mrb[1].mxu1 }
 0x288   :  { %351 = vst [vmem:[#allocation8] sm:$0x3] %v348_v48 }
 0x289   :  { %502 = shalt.err (!%p499_p0)
}
 0x28a   :  { %s503_s13 = scalar_lea.hbm %s639_s5, 32 }
 0x28b   :  { %p504_p1 = scmp.ne.s32.totalorder %s639_s5, %s503_s13  ;;  %p507_p2 = scmp.lt.u32.totalorder %s503_s13, %s639_s5 }
 0x28d   :  { %p509_p3 = pnand %p507_p2, %p504_p1 }
 0x28f   :  { %512 = shalt.err (!%p509_p3)
}
 0x290   :  { %361 = dma.vmem_to_hbm [thread:$0]  %s359_s10, 32, %s639_s5, [#allocation4]  }
 0x291   :  { %517 = dma.done.wait [#allocation4], 32  }
 0x292   :  { %518 = vsyncadd [#allocation4], 4294967264 }
 0x293   :  { %365 = vsyncpa [#allocation3], 1 }
 0x294   :  { %366 = vsyncpa [#allocation6], 1 }
 0x295   :  { %367 = vsyncpa [#allocation4], 1 }

</bundles_post_ra>
